<compile_context>
chip_gen: v7x
topology: tpu7x:2x2x1
jax: 0.10.0
libtpu: 0.0.40
codegen_flags: <defaults>
</compile_context>

<pallas_src>
import jax
import jax.numpy as jnp
from jax.experimental import pallas as pl
from jax.experimental.pallas import tpu as pltpu


def qnet_kernel(xa_ref, w1_ref, b1_ref, wq_ref, bq_ref, w3_ref, b3_ref, out_ref):
    # Fused layer 1: h = relu([x|a] @ W1 + b1)  -> (TB, 128) lane-dense
    h = jnp.dot(xa_ref[...], w1_ref[...], preferred_element_type=jnp.float32)
    h = jnp.maximum(h + b1_ref[...], 0.0)

    # Layer 2: q = relu(h @ Wq + bq)            -> (TB, 32)
    q = jnp.dot(h, wq_ref[...], preferred_element_type=jnp.float32)
    q = jnp.maximum(q + bq_ref[...], 0.0)

    # Layer 3 (32 -> 1): N=1 matmul would use <1% of the MXU; do it as a
    # VPU multiply + XLU lane reduction instead.
    out = jnp.sum(q * w3_ref[...], axis=-1, keepdims=True) + b3_ref[...]
    out_ref[...] = out                          # (TB, 1)


def fuse_params(params):
    """Build the fused/block-diagonal parameter set (do this once, not per call)."""
    ws, bs = params["ws"], params["bs"]     # (3, 64), (1, 64)
    wa, ba = params["wa"], params["ba"]     # (1, 64), (1, 64)
    wq, bq = params["wq"], params["bq"]     # (128, 32), (1, 32)
    w3, b3 = params["w3"], params["b3"]     # (32, 1), (1, 1)

    w1 = jnp.zeros((4, 128), jnp.float32)
    w1 = w1.at[0:3, 0:64].set(ws)           # state branch
    w1 = w1.at[3:4, 64:128].set(wa)         # action branch
    b1 = jnp.concatenate([bs, ba], axis=1)  # (1, 128)
    w3_row = w3.reshape(1, 32)              # row vector for VPU mul + reduce
    return dict(w1=w1, b1=b1, wq=wq, bq=bq, w3=w3_row, b3=b3)


def _pick_tb(batch):
    # Modest batch tile: one vreg-sublane-multiple tile for tiny batches,
    # 512 rows otherwise (well under v7x's 64 MiB/core VMEM budget).
    return 128 if batch <= 128 else 512


def qnet_forward(x, a, fused, *, tb=None):
    """x: (B, 3) f32, a: (B, 1) f32, fused: output of fuse_params -> (B, 1) f32."""
    B = x.shape[0]
    if tb is None:
        tb = _pick_tb(B)

    xa = jnp.concatenate([x, a], axis=1)    # (B, 4)
    b_pad = pl.cdiv(B, tb) * tb
    if b_pad != B:
        xa = jnp.pad(xa, ((0, b_pad - B), (0, 0)))
    num_tiles = b_pad // tb

    grid_spec = pltpu.PrefetchScalarGridSpec(
        num_scalar_prefetch=0,
        grid=(num_tiles,),
        in_specs=[
            pl.BlockSpec((tb, 4), lambda i: (i, 0)),      # [x|a] batch tile
            pl.BlockSpec((4, 128), lambda i: (0, 0)),     # W1 (resident)
            pl.BlockSpec((1, 128), lambda i: (0, 0)),     # b1
            pl.BlockSpec((128, 32), lambda i: (0, 0)),    # Wq
            pl.BlockSpec((1, 32), lambda i: (0, 0)),      # bq
            pl.BlockSpec((1, 32), lambda i: (0, 0)),      # w3 row
            pl.BlockSpec((1, 1), lambda i: (0, 0)),       # b3
        ],
        out_specs=pl.BlockSpec((tb, 1), lambda i: (i, 0)),
    )

    out = pl.pallas_call(
        qnet_kernel,
        out_shape=jax.ShapeDtypeStruct((b_pad, 1), jnp.float32),
        grid_spec=grid_spec,
        compiler_params=pltpu.CompilerParams(
            dimension_semantics=("parallel",),
        ),
    )(xa, fused["w1"], fused["b1"], fused["wq"], fused["bq"],
      fused["w3"], fused["b3"])

    return out[:B]


def init_params(key):
    """Deterministic init mimicking torch.nn.Linear (U(-1/sqrt(in), 1/sqrt(in)))."""
    def linear(k, fan_in, fan_out):
        kw, kb = jax.random.split(k)
        bound = 1.0 / (fan_in ** 0.5)
        w = jax.random.uniform(kw, (fan_in, fan_out), jnp.float32, -bound, bound)
        b = jax.random.uniform(kb, (1, fan_out), jnp.float32, -bound, bound)
        return w, b

    k1, k2, k3, k4 = jax.random.split(key, 4)
    ws, bs = linear(k1, 3, 64)
    wa, ba = linear(k2, 1, 64)
    wq, bq = linear(k3, 128, 32)
    w3, b3 = linear(k4, 32, 1)
    return dict(ws=ws, bs=bs, wa=wa, ba=ba, wq=wq, bq=bq, w3=w3, b3=b3)


def qnet_reference(x, a, params):
    h1 = jnp.maximum(x @ params["ws"] + params["bs"], 0.0)
    h2 = jnp.maximum(a @ params["wa"] + params["ba"], 0.0)
    cat = jnp.concatenate([h1, h2], axis=1)
    q = jnp.maximum(cat @ params["wq"] + params["bq"], 0.0)
    return q @ params["w3"] + params["b3"]


if __name__ == "__main__":
    key = jax.random.PRNGKey(0)
    kp, kx, ka = jax.random.split(key, 3)

    params = init_params(kp)
    fused = fuse_params(params)

    B = 8  # small batch; state dim 3, action dim 1 (Pendulum-like)
    x = jax.random.normal(kx, (B, 3), jnp.float32)
    a = jax.random.normal(ka, (B, 1), jnp.float32)

    out = qnet_forward(x, a, fused)
    out = jax.block_until_ready(out)

    ref = qnet_reference(x, a, params)
    assert out.shape == (B, 1)
    assert jnp.allclose(out, ref, atol=1e-5, rtol=1e-5), "mismatch vs reference"

    print("KERNEL_OK")
</pallas_src>

<mosaic_0001>
module attributes {stable_mosaic.version = 11 : i64} {
  func.func @qnet_kernel(%arg0: i32, %arg1: memref<128x4xf32, #tpu.memory_space<vmem>>, %arg2: memref<4x128xf32, #tpu.memory_space<vmem>>, %arg3: memref<1x128xf32, #tpu.memory_space<vmem>>, %arg4: memref<128x32xf32, #tpu.memory_space<vmem>>, %arg5: memref<1x32xf32, #tpu.memory_space<vmem>>, %arg6: memref<1x32xf32, #tpu.memory_space<vmem>>, %arg7: memref<1x1xf32, #tpu.memory_space<vmem>>, %arg8: memref<128x1xf32, #tpu.memory_space<vmem>>) attributes {dimension_semantics = [#tpu.dimension_semantics<parallel>], iteration_bounds = array<i64: 1>, scalar_prefetch = 0 : i64, scratch_operands = 0 : i64, tpu.core_type = #tpu.core_type<tc>, window_params = [{transform_indices = @transform_0, window_bounds = array<i64: 128, 4>}, {pipeline_mode = #tpu.pipeline_mode<synchronous>, transform_indices = @transform_1, window_bounds = array<i64: 4, 128>}, {pipeline_mode = #tpu.pipeline_mode<synchronous>, transform_indices = @transform_2, window_bounds = array<i64: 1, 128>}, {pipeline_mode = #tpu.pipeline_mode<synchronous>, transform_indices = @transform_3, window_bounds = array<i64: 128, 32>}, {pipeline_mode = #tpu.pipeline_mode<synchronous>, transform_indices = @transform_4, window_bounds = array<i64: 1, 32>}, {pipeline_mode = #tpu.pipeline_mode<synchronous>, transform_indices = @transform_5, window_bounds = array<i64: 1, 32>}, {pipeline_mode = #tpu.pipeline_mode<synchronous>, transform_indices = @transform_6, window_bounds = array<i64: 1, 1>}, {transform_indices = @transform_7, window_bounds = array<i64: 128, 1>}]} {
    %c0 = arith.constant 0 : index
    %c0_0 = arith.constant 0 : index
    %0 = vector.load %arg1[%c0, %c0_0] : memref<128x4xf32, #tpu.memory_space<vmem>>, vector<128x4xf32>
    %c0_1 = arith.constant 0 : index
    %c0_2 = arith.constant 0 : index
    %1 = vector.load %arg2[%c0_1, %c0_2] : memref<4x128xf32, #tpu.memory_space<vmem>>, vector<4x128xf32>
    %cst = arith.constant dense<0.000000e+00> : vector<128x128xf32>
    %2 = tpu.matmul %0, %1, %cst {dimension_numbers = #tpu.dot_dimension_numbers<[1], [0], [0], [1], [0, 0, 1, 1], [], []>} : vector<128x4xf32>, vector<4x128xf32>, vector<128x128xf32> -> vector<128x128xf32>
    %c0_3 = arith.constant 0 : index
    %c0_4 = arith.constant 0 : index
    %3 = vector.load %arg3[%c0_3, %c0_4] : memref<1x128xf32, #tpu.memory_space<vmem>>, vector<1x128xf32>
    %4 = vector.broadcast %3 : vector<1x128xf32> to vector<128x128xf32>
    %5 = arith.addf %2, %4 : vector<128x128xf32>
    %cst_5 = arith.constant 0.000000e+00 : f32
    %6 = vector.broadcast %cst_5 : f32 to vector<128x128xf32>
    %7 = arith.maximumf %5, %6 : vector<128x128xf32>
    %c0_6 = arith.constant 0 : index
    %c0_7 = arith.constant 0 : index
    %8 = vector.load %arg4[%c0_6, %c0_7] : memref<128x32xf32, #tpu.memory_space<vmem>>, vector<128x32xf32>
    %cst_8 = arith.constant dense<0.000000e+00> : vector<128x32xf32>
    %9 = tpu.matmul %7, %8, %cst_8 {dimension_numbers = #tpu.dot_dimension_numbers<[1], [0], [0], [1], [0, 0, 1, 1], [], []>} : vector<128x128xf32>, vector<128x32xf32>, vector<128x32xf32> -> vector<128x32xf32>
    %c0_9 = arith.constant 0 : index
    %c0_10 = arith.constant 0 : index
    %10 = vector.load %arg5[%c0_9, %c0_10] : memref<1x32xf32, #tpu.memory_space<vmem>>, vector<1x32xf32>
    %11 = vector.broadcast %10 : vector<1x32xf32> to vector<128x32xf32>
    %12 = arith.addf %9, %11 : vector<128x32xf32>
    %cst_11 = arith.constant 0.000000e+00 : f32
    %13 = vector.broadcast %cst_11 : f32 to vector<128x32xf32>
    %14 = arith.maximumf %12, %13 : vector<128x32xf32>
    %c0_12 = arith.constant 0 : index
    %c0_13 = arith.constant 0 : index
    %15 = vector.load %arg6[%c0_12, %c0_13] : memref<1x32xf32, #tpu.memory_space<vmem>>, vector<1x32xf32>
    %16 = vector.broadcast %15 : vector<1x32xf32> to vector<128x32xf32>
    %17 = arith.mulf %14, %16 : vector<128x32xf32>
    %cst_14 = arith.constant dense<0.000000e+00> : vector<128xf32>
    %18 = vector.multi_reduction <add>, %17, %cst_14 [1] : vector<128x32xf32> to vector<128xf32>
    %19 = vector.shape_cast %18 : vector<128xf32> to vector<128x1xf32>
    %c0_15 = arith.constant 0 : index
    %c0_16 = arith.constant 0 : index
    %20 = vector.load %arg7[%c0_15, %c0_16] : memref<1x1xf32, #tpu.memory_space<vmem>>, vector<1x1xf32>
    %21 = vector.broadcast %20 : vector<1x1xf32> to vector<128x1xf32>
    %22 = arith.addf %19, %21 : vector<128x1xf32>
    %c0_17 = arith.constant 0 : index
    %c0_18 = arith.constant 0 : index
    %23 = vector.load %arg8[%c0_17, %c0_18] : memref<128x1xf32, #tpu.memory_space<vmem>>, vector<128x1xf32>
    tpu.vector_store %arg8[%c0_17, %c0_18], %22 {strides = array<i32>} : memref<128x1xf32, #tpu.memory_space<vmem>>, vector<128x1xf32>,
    return
  }
  func.func @transform_0(%arg0: i32) -> (i32, i32) {
    %c0_i32 = arith.constant 0 : i32
    %c0_i32_0 = arith.constant 0 : i32
    return %arg0, %c0_i32 : i32, i32
  }
  func.func @transform_1(%arg0: i32) -> (i32, i32) {
    %c0_i32 = arith.constant 0 : i32
    %c0_i32_0 = arith.constant 0 : i32
    %c0_i32_1 = arith.constant 0 : i32
    return %c0_i32, %c0_i32_0 : i32, i32
  }
  func.func @transform_2(%arg0: i32) -> (i32, i32) {
    %c0_i32 = arith.constant 0 : i32
    %c0_i32_0 = arith.constant 0 : i32
    %c0_i32_1 = arith.constant 0 : i32
    return %c0_i32, %c0_i32_0 : i32, i32
  }
  func.func @transform_3(%arg0: i32) -> (i32, i32) {
    %c0_i32 = arith.constant 0 : i32
    %c0_i32_0 = arith.constant 0 : i32
    %c0_i32_1 = arith.constant 0 : i32
    return %c0_i32, %c0_i32_0 : i32, i32
  }
  func.func @transform_4(%arg0: i32) -> (i32, i32) {
    %c0_i32 = arith.constant 0 : i32
    %c0_i32_0 = arith.constant 0 : i32
    %c0_i32_1 = arith.constant 0 : i32
    return %c0_i32, %c0_i32_0 : i32, i32
  }
  func.func @transform_5(%arg0: i32) -> (i32, i32) {
    %c0_i32 = arith.constant 0 : i32
    %c0_i32_0 = arith.constant 0 : i32
    %c0_i32_1 = arith.constant 0 : i32
    return %c0_i32, %c0_i32_0 : i32, i32
  }
  func.func @transform_6(%arg0: i32) -> (i32, i32) {
    %c0_i32 = arith.constant 0 : i32
    %c0_i32_0 = arith.constant 0 : i32
    %c0_i32_1 = arith.constant 0 : i32
    return %c0_i32, %c0_i32_0 : i32, i32
  }
  func.func @transform_7(%arg0: i32) -> (i32, i32) {
    %c0_i32 = arith.constant 0 : i32
    %c0_i32_0 = arith.constant 0 : i32
    return %arg0, %c0_i32 : i32, i32
  }
}

</mosaic_0001>

<bundles_post_ra>
// kernel: tpu_custom_call.1
= control target key start
LH: loop header
LB: loop body
LE: loop exit
PB: predicated region body
PF: predicated region fallthrough
CT: control target
= control target key end

     0   :  { %vm101_vm0 = vcmask 1043456   ;;  %vm52_vm1 = vcmask 31744   ;;  %vm473_vm2 = vcmask 261120   ;;  %vm545_vm3 = vcmask 7168   ;;  %s1049_s1 = inlined_call_operand.vmem [shape: f32[4,128], index: 1, kind: input, shape index: {}]   ;;  %s1050_s0 = inlined_call_operand.vmem [shape: f32[128,4], index: 0, kind: input, shape index: {}]   ;;  %s1051_s3 = inlined_call_operand.vmem [shape: f32[128,32], index: 3, kind: input, shape index: {}]   ;;  %s1052_s2 = inlined_call_operand.vmem [shape: f32[1,128], index: 2, kind: input, shape index: {}]   ;;  %s1053_s6 = inlined_call_operand.<no memory space> [shape: f32[1,1], index: 6, kind: input, shape index: {}]   ;;  %s1054_s4 = inlined_call_operand.vmem [shape: f32[1,32], index: 4, kind: input, shape index: {}]   ;;  %s1055_s5 = inlined_call_operand.vmem [shape: f32[1,32], index: 5, kind: input, shape index: {}]   ;;  %s1056_s7 = inlined_call_operand.vmem [shape: f32[128,1], index: 7, kind: output, shape index: {}]  }
   0x1   :  { %v44_v0 = vld [vmem:[%s1049_s1] sm:$0xf]  ;;  %v29_v2 = vld [vmem:[%s1050_s0 + $0x8] sm:$0xff]  ;;  %v30_v3 = vld [vmem:[%s1050_s0 + $0x10] sm:$0xff] }
   0x2   :  { %v28_v1 = vld [vmem:[%s1050_s0] sm:$0xff]  ;;  %636 = vmatprep.subr.msk.mxu0 %vm101_vm0, %v44_v0  ;;  %v31_v4 = vld [vmem:[%s1050_s0 + $0x18] sm:$0xff]  ;;  %v267_v7 = vld [vmem:[%s1051_s3 + $0x8] sm:$0xff] }
   0x3   :  { %638 = vmatprep.mubr.msk.f32.mxu0 %vm52_vm1, %v28_v1  ;;  %637 = vmatpush3.msk.msra.mxu0 %vm101_vm0, %v44_v0  ;;  %v32_v5 = vld [vmem:[%s1050_s0 + $0x20] sm:$0xff]  ;;  %v268_v8 = vld [vmem:[%s1051_s3 + $0x10] sm:$0xff]  ;;  %v269_v9 = vld [vmem:[%s1051_s3 + $0x18] sm:$0xff] }
   0x4   :  { %639 = vmatmul.mubr.msk.f32.vlgmr.msra.gmra.mrb[0].mxu0 %vm52_vm1, %v29_v2  ;;  %v266_v6 = vld [vmem:[%s1051_s3] sm:$0xff]  ;;  %v722_v11 = vpack.c.bf16 %v269_v9, %v268_v8  ;;  %v33_v12 = vld [vmem:[%s1050_s0 + $0x28] sm:$0xff]  ;;  %v34_v15 = vld [vmem:[%s1050_s0 + $0x30] sm:$0xff] }
   0x5   :  { %641 = vmatprep.mubr.msk.f32.mxu0 %vm52_vm1, %v30_v3  ;;  %v718_v10 = vpack.c.bf16 %v267_v7, %v266_v6  ;;  %v270_v13 = vld [vmem:[%s1051_s3 + $0x20] sm:$0xff]  ;;  %v271_v14 = vld [vmem:[%s1051_s3 + $0x28] sm:$0xff]  ;;  %v35_v17 = vld [vmem:[%s1050_s0 + $0x38] sm:$0xff] }
   0x6   :  { %v726_v16 = vpack.c.bf16 %v271_v14, %v270_v13  ;;  %v272_v18 = vld [vmem:[%s1051_s3 + $0x30] sm:$0xff]  ;;  %v273_v19 = vld [vmem:[%s1051_s3 + $0x38] sm:$0xff]  ;;  %v36_v20 = vld [vmem:[%s1050_s0 + $0x40] sm:$0xff] }
   0x7   :  { %719 = vmatprep.subr.bf16.mxu0 %v718_v10  ;;  %750 = vmatprep.subr.bf16.mxu1 %v718_v10  ;;  %v730_v21 = vpack.c.bf16 %v273_v19, %v272_v18  ;;  %v37_v22 = vld [vmem:[%s1050_s0 + $0x48] sm:$0xff]  ;;  %v274_v23 = vld [vmem:[%s1051_s3 + $0x40] sm:$0xff]  ;;  %v38_v25 = vld [vmem:[%s1050_s0 + $0x50] sm:$0xff] }
   0x8   :  { %642 = vmatmul.mubr.msk.f32.gmra.mrb[2].mxu0 %vm52_vm1, %v31_v4  ;;  %758 = vmatpush3.bf16.msra.mxu1 %v718_v10  ;;  %v275_v24 = vld [vmem:[%s1051_s3 + $0x48] sm:$0xff]  ;;  %v39_v27 = vld [vmem:[%s1050_s0 + $0x58] sm:$0xff]  ;;  %v276_v28 = vld [vmem:[%s1051_s3 + $0x50] sm:$0xff] }
   0x9   :  { %644 = vmatprep.mubr.msk.f32.mxu0 %vm52_vm1, %v32_v5  ;;  %721 = vmatpush3.bf16.msra.mxu0 %v718_v10  ;;  %v734_v26 = vpack.c.bf16 %v275_v24, %v274_v23  ;;  %v277_v29 = vld [vmem:[%s1051_s3 + $0x58] sm:$0xff]  ;;  %v40_v30 = vld [vmem:[%s1050_s0 + $0x60] sm:$0xff]  ;;  %v41_v32 = vld [vmem:[%s1050_s0 + $0x68] sm:$0xff] }
   0xa   :  { %723 = vmatprep.subr.bf16.mxu0 %v722_v11  ;;  %751 = vmatprep.subr.bf16.mxu1 %v722_v11  ;;  %v738_v31 = vpack.c.bf16 %v277_v29, %v276_v28  ;;  %v278_v33 = vld [vmem:[%s1051_s3 + $0x60] sm:$0xff]  ;;  %v279_v34 = vld [vmem:[%s1051_s3 + $0x68] sm:$0xff]  ;;  %v42_v35 = vld [vmem:[%s1050_s0 + $0x70] sm:$0xff] }
   0xb   :  { %v742_v36 = vpack.c.bf16 %v279_v34, %v278_v33  ;;  %v43_v37 = vld [vmem:[%s1050_s0 + $0x78] sm:$0xff]  ;;  %v280_v38 = vld [vmem:[%s1051_s3 + $0x70] sm:$0xff]  ;;  %v566_v41 = vld [vmem:[%s1052_s2] ss:$0 sm:$0xff] }
   0xc   :  { %645 = vmatmul.mubr.msk.f32.gmra.mrb[4].mxu0 %vm52_vm1, %v33_v12  ;;  %759 = vmatpush3.bf16.msra.mxu1 %v722_v11  ;;  %v281_v39 = vld [vmem:[%s1051_s3 + $0x78] sm:$0xff] }
   0xd   :  { %647 = vmatprep.mubr.msk.f32.mxu0 %vm52_vm1, %v34_v15  ;;  %725 = vmatpush3.bf16.msra.mxu0 %v722_v11  ;;  %v746_v40 = vpack.c.bf16 %v281_v39, %v280_v38 }
   0xe   :  { %727 = vmatprep.subr.bf16.mxu0 %v726_v16  ;;  %752 = vmatprep.subr.bf16.mxu1 %v726_v16 }
  0x10   :  { %648 = vmatmul.mubr.msk.f32.gmra.mrb[6].mxu0 %vm52_vm1, %v35_v17  ;;  %760 = vmatpush3.bf16.msra.mxu1 %v726_v16 }
  0x11   :  { %650 = vmatprep.mubr.msk.f32.mxu0 %vm52_vm1, %v36_v20  ;;  %729 = vmatpush3.bf16.msra.mxu0 %v726_v16 }
  0x12   :  { %731 = vmatprep.subr.bf16.mxu0 %v730_v21  ;;  %753 = vmatprep.subr.bf16.mxu1 %v730_v21 }
  0x14   :  { %651 = vmatmul.mubr.msk.f32.gmra.mrb[8].mxu0 %vm52_vm1, %v37_v22  ;;  %761 = vmatpush3.bf16.msra.mxu1 %v730_v21 }
  0x15   :  { %653 = vmatprep.mubr.msk.f32.mxu0 %vm52_vm1, %v38_v25  ;;  %733 = vmatpush3.bf16.msra.mxu0 %v730_v21 }
  0x16   :  { %735 = vmatprep.subr.bf16.mxu0 %v734_v26  ;;  %754 = vmatprep.subr.bf16.mxu1 %v734_v26 }
  0x18   :  { %654 = vmatmul.mubr.msk.f32.gmra.mrb[10].mxu0 %vm52_vm1, %v39_v27  ;;  %762 = vmatpush3.bf16.msra.mxu1 %v734_v26  ;;  %v930_v27 = vld [vmem:[%s1054_s4] ss:$0 sm:$0xff] }
  0x19   :  { %656 = vmatprep.mubr.msk.f32.mxu0 %vm52_vm1, %v40_v30  ;;  %737 = vmatpush3.bf16.msra.mxu0 %v734_v26  ;;  %v12_v26 = vstv %s1053_s6 }
  0x1a   :  { %739 = vmatprep.subr.bf16.mxu0 %v738_v31  ;;  %755 = vmatprep.subr.bf16.mxu1 %v738_v31  ;;  %13 = vst [vmem:[#allocation2] sm:$0x1] %v12_v26 }
  0x1c   :  { %657 = vmatmul.mubr.msk.f32.gmra.mrb[12].mxu0 %vm52_vm1, %v41_v32  ;;  %763 = vmatpush3.bf16.msra.mxu1 %v738_v31  ;;  %v937_v32 = vld [vmem:[%s1055_s5] ss:$0 sm:$0xff] }
  0x1d   :  { %659 = vmatprep.mubr.msk.f32.mxu0 %vm52_vm1, %v42_v35  ;;  %741 = vmatpush3.bf16.msra.mxu0 %v738_v31 }
  0x1e   :  { %743 = vmatprep.subr.bf16.mxu0 %v742_v36  ;;  %756 = vmatprep.subr.bf16.mxu1 %v742_v36 }
  0x20   :  { %660 = vmatmul.mubr.msk.f32.gmra.mrb[14].mxu0 %vm52_vm1, %v43_v37  ;;  %764 = vmatpush3.bf16.msra.mxu1 %v742_v36 }
  0x21   :  { %745 = vmatpush3.bf16.msra.mxu0 %v742_v36  ;;  %757 = vmatprep.subr.bf16.mxu1 %v746_v40 }
  0x22   :  { %747 = vmatprep.subr.bf16.mxu0 %v746_v40 }
  0x24   :  { %765 = vmatpush3.bf16.msra.mxu1 %v746_v40 }
  0x25   :  { %749 = vmatpush3.bf16.msra.mxu0 %v746_v40 }
  0xd7   :  { %v640_v42 = vpop.f32.mrb[0].mxu0 }
  0xd8   :  { %v177_v43 = vadd.f32 %v640_v42, %v566_v41  ;;  %v171_v44 = vpop.f32.mrb[1].mxu0 }
  0xd9   :  { %v172_v45 = vadd.f32 %v566_v41, %v171_v44 }
  0xda   :  { %v251_v48 = vmax.f32 %v177_v43, 0.0 }
  0xdb   :  { %v250_v46 = vmax.f32 %v172_v45, 0.0  ;;  %v643_v47 = vpop.f32.mrb[2].mxu0 }
  0xdc   :  { %v187_v49 = vadd.f32 %v643_v47, %v566_v41  ;;  %v181_v50 = vpop.f32.mrb[3].mxu0 }
  0xdd   :  { %v182_v51 = vadd.f32 %v566_v41, %v181_v50  ;;  %694 = vmatprep.mubr.f32.mxu0 %v250_v46 }
  0xde   :  { %695 = vmatmul.mubr.f32.vlgmr.msra.gmra.mrb[16].mxu0 %v251_v48  ;;  %v253_v54 = vmax.f32 %v187_v49, 0.0 }
  0xdf   :  { %v252_v52 = vmax.f32 %v182_v51, 0.0  ;;  %v646_v53 = vpop.f32.mrb[4].mxu0 }
  0xe0   :  { %v197_v55 = vadd.f32 %v646_v53, %v566_v41  ;;  %v191_v56 = vpop.f32.mrb[5].mxu0 }
  0xe1   :  { %v192_v57 = vadd.f32 %v566_v41, %v191_v56  ;;  %697 = vmatprep.mubr.f32.mxu0 %v252_v52 }
  0xe2   :  { %v255_v58 = vmax.f32 %v197_v55, 0.0  ;;  %698 = vmatmul.mubr.f32.gmra.mrb[18].mxu0 %v253_v54 }
  0xe3   :  { %v254_v59 = vmax.f32 %v192_v57, 0.0  ;;  %v649_v60 = vpop.f32.mrb[6].mxu0 }
  0xe4   :  { %v207_v61 = vadd.f32 %v649_v60, %v566_v41  ;;  %v201_v62 = vpop.f32.mrb[7].mxu0 }
  0xe5   :  { %700 = vmatprep.mubr.f32.mxu0 %v254_v59  ;;  %v202_v63 = vadd.f32 %v566_v41, %v201_v62 }
  0xe6   :  { %v257_v0 = vmax.f32 %v207_v61, 0.0  ;;  %701 = vmatmul.mubr.f32.gmra.mrb[20].mxu0 %v255_v58 }
  0xe7   :  { %v652_v1 = vpop.f32.mrb[8].mxu0  ;;  %v256_v2 = vmax.f32 %v202_v63, 0.0 }
  0xe8   :  { %v217_v3 = vadd.f32 %v652_v1, %v566_v41  ;;  %v211_v4 = vpop.f32.mrb[9].mxu0 }
  0xe9   :  { %v212_v5 = vadd.f32 %v566_v41, %v211_v4  ;;  %703 = vmatprep.mubr.f32.mxu1 %v256_v2 }
  0xea   :  { %v259_v6 = vmax.f32 %v217_v3, 0.0  ;;  %704 = vmatmul.mubr.f32.vlgmr.msra.gmra.mrb[0].mxu1 %v257_v0 }
  0xeb   :  { %v258_v7 = vmax.f32 %v212_v5, 0.0  ;;  %v655_v8 = vpop.f32.mrb[10].mxu0 }
  0xec   :  { %v227_v9 = vadd.f32 %v655_v8, %v566_v41  ;;  %v221_v10 = vpop.f32.mrb[11].mxu0 }
  0xed   :  { %v222_v11 = vadd.f32 %v566_v41, %v221_v10  ;;  %706 = vmatprep.mubr.f32.mxu1 %v258_v7 }
  0xee   :  { %v261_v12 = vmax.f32 %v227_v9, 0.0  ;;  %707 = vmatmul.mubr.f32.gmra.mrb[2].mxu1 %v259_v6 }
  0xef   :  { %v260_v13 = vmax.f32 %v222_v11, 0.0  ;;  %v658_v14 = vpop.f32.mrb[12].mxu0 }
  0xf0   :  { %v237_v15 = vadd.f32 %v658_v14, %v566_v41  ;;  %v231_v16 = vpop.f32.mrb[13].mxu0 }
  0xf1   :  { %v232_v17 = vadd.f32 %v566_v41, %v231_v16  ;;  %709 = vmatprep.mubr.f32.mxu1 %v260_v13 }
  0xf2   :  { %v263_v18 = vmax.f32 %v237_v15, 0.0  ;;  %710 = vmatmul.mubr.f32.gmra.mrb[4].mxu1 %v261_v12 }
  0xf3   :  { %v262_v19 = vmax.f32 %v232_v17, 0.0  ;;  %v661_v20 = vpop.f32.mrb[14].mxu0 }
  0xf4   :  { %v247_v21 = vadd.f32 %v661_v20, %v566_v41  ;;  %v241_v22 = vpop.f32.mrb[15].mxu0 }
  0xf5   :  { %v242_v23 = vadd.f32 %v566_v41, %v241_v22  ;;  %712 = vmatprep.mubr.f32.mxu1 %v262_v19 }
  0xf6   :  { %v265_v24 = vmax.f32 %v247_v21, 0.0  ;;  %713 = vmatmul.mubr.f32.gmra.mrb[6].mxu1 %v263_v18 }
  0xf7   :  { %v264_v25 = vmax.f32 %v242_v23, 0.0 }
  0xf9   :  { %715 = vmatprep.mubr.f32.mxu1 %v264_v25 }
  0xfa   :  { %716 = vmatmul.mubr.f32.gmra.mrb[8].mxu1 %v265_v24 }
 0x1b1   :  { %v696_v28 = vpop.f32.mrb[16].mxu0 }
 0x1b2   :  { %v361_v29 = vadd.f32 %v696_v28, %v930_v27  ;;  %v355_v30 = vpop.f32.mrb[17].mxu0 }
 0x1b3   :  { %v356_v31 = vadd.f32 %v930_v27, %v355_v30 }
 0x1b4   :  { %v435_v33 = vmax.f32 %v361_v29, 0.0 }
 0x1b5   :  { %v434_v34 = vmax.f32 %v356_v31, 0.0  ;;  %v699_v35 = vpop.f32.mrb[18].mxu0 }
 0x1b6   :  { %v371_v36 = vadd.f32 %v699_v35, %v930_v27  ;;  %v365_v37 = vpop.f32.mrb[19].mxu0  ;;  %v458_v38 = vmul.f32 %v937_v32, %v435_v33 }
 0x1b7   :  { %v366_v39 = vadd.f32 %v930_v27, %v365_v37  ;;  %v457_v42 = vmul.f32 %v937_v32, %v434_v34 }
 0x1b8   :  { %v437_v40 = vmax.f32 %v371_v36, 0.0  ;;  %v477_v41 = vsel %vm473_vm2, %v458_v38, 0.0 }
 0x1b9   :  { %v436_v43 = vmax.f32 %v366_v39, 0.0  ;;  %478 = vadd.xlane.f32.xlu0 %v477_v41  ;;  %v702_v44 = vpop.f32.mrb[20].mxu0  ;;  %v474_v51 = vsel %vm473_vm2, %v457_v42, 0.0 }
 0x1ba   :  { %v381_v45 = vadd.f32 %v702_v44, %v930_v27  ;;  %v375_v46 = vpop.f32.mrb[21].mxu0  ;;  %v460_v47 = vmul.f32 %v937_v32, %v437_v40 }
 0x1bb   :  { %v376_v48 = vadd.f32 %v930_v27, %v375_v46  ;;  %v459_v52 = vmul.f32 %v937_v32, %v436_v43  ;;  %v586_v46 = vld [vmem:[#allocation2] ss:$0 sm:$0xff] }
 0x1bc   :  { %v439_v49 = vmax.f32 %v381_v45, 0.0  ;;  %v483_v50 = vsel %vm473_vm2, %v460_v47, 0.0 }
 0x1bd   :  { %v438_v53 = vmax.f32 %v376_v48, 0.0  ;;  %v705_v54 = vpop.f32.mrb[0].mxu1  ;;  %484 = vadd.xlane.f32.xlu1 %v483_v50  ;;  %475 = vadd.xlane.f32.xlu0 %v474_v51  ;;  %v480_v60 = vsel %vm473_vm2, %v459_v52, 0.0 }
 0x1be   :  { %v391_v55 = vadd.f32 %v705_v54, %v930_v27  ;;  %v385_v56 = vpop.f32.mrb[1].mxu1  ;;  %v462_v61 = vmul.f32 %v937_v32, %v439_v49 }
 0x1bf   :  { %v386_v57 = vadd.f32 %v930_v27, %v385_v56  ;;  %v461_v58 = vmul.f32 %v937_v32, %v438_v53 }
 0x1c0   :  { %v441_v59 = vmax.f32 %v391_v55, 0.0  ;;  %v489_v6 = vsel %vm473_vm2, %v462_v61, 0.0 }
 0x1c1   :  { %v440_v62 = vmax.f32 %v386_v57, 0.0  ;;  %v708_v63 = vpop.f32.mrb[2].mxu1  ;;  %481 = vadd.xlane.f32.xlu1 %v480_v60  ;;  %v486_v0 = vsel %vm473_vm2, %v461_v58, 0.0 }
 0x1c2   :  { %v401_v1 = vadd.f32 %v708_v63, %v930_v27  ;;  %v395_v2 = vpop.f32.mrb[3].mxu1  ;;  %487 = vadd.xlane.f32.xlu0 %v486_v0  ;;  %v464_v7 = vmul.f32 %v937_v32, %v441_v59 }
 0x1c3   :  { %v396_v3 = vadd.f32 %v930_v27, %v395_v2  ;;  %v463_v4 = vmul.f32 %v937_v32, %v440_v62 }
 0x1c4   :  { %v443_v5 = vmax.f32 %v401_v1, 0.0  ;;  %v495_v16 = vsel %vm473_vm2, %v464_v7, 0.0 }
 0x1c5   :  { %v442_v8 = vmax.f32 %v396_v3, 0.0  ;;  %v711_v9 = vpop.f32.mrb[4].mxu1  ;;  %490 = vadd.xlane.f32.xlu1 %v489_v6  ;;  %v492_v10 = vsel %vm473_vm2, %v463_v4, 0.0 }
 0x1c6   :  { %v411_v11 = vadd.f32 %v711_v9, %v930_v27  ;;  %v405_v12 = vpop.f32.mrb[5].mxu1  ;;  %493 = vadd.xlane.f32.xlu0 %v492_v10  ;;  %v466_v17 = vmul.f32 %v937_v32, %v443_v5 }
 0x1c7   :  { %v406_v13 = vadd.f32 %v930_v27, %v405_v12  ;;  %v465_v14 = vmul.f32 %v937_v32, %v442_v8 }
 0x1c8   :  { %v445_v15 = vmax.f32 %v411_v11, 0.0  ;;  %v501_v26 = vsel %vm473_vm2, %v466_v17, 0.0 }
 0x1c9   :  { %v444_v18 = vmax.f32 %v406_v13, 0.0  ;;  %v714_v19 = vpop.f32.mrb[6].mxu1  ;;  %496 = vadd.xlane.f32.xlu1 %v495_v16  ;;  %v498_v20 = vsel %vm473_vm2, %v465_v14, 0.0 }
 0x1ca   :  { %v421_v21 = vadd.f32 %v714_v19, %v930_v27  ;;  %v415_v22 = vpop.f32.mrb[7].mxu1  ;;  %499 = vadd.xlane.f32.xlu0 %v498_v20  ;;  %v468_v28 = vmul.f32 %v937_v32, %v445_v15 }
 0x1cb   :  { %v416_v23 = vadd.f32 %v930_v27, %v415_v22  ;;  %v467_v24 = vmul.f32 %v937_v32, %v444_v18 }
 0x1cc   :  { %v447_v25 = vmax.f32 %v421_v21, 0.0  ;;  %v507_v38 = vsel %vm473_vm2, %v468_v28, 0.0 }
 0x1cd   :  { %v446_v29 = vmax.f32 %v416_v23, 0.0  ;;  %v717_v30 = vpop.f32.mrb[8].mxu1  ;;  %502 = vadd.xlane.f32.xlu1 %v501_v26  ;;  %v504_v31 = vsel %vm473_vm2, %v467_v24, 0.0 }
 0x1ce   :  { %v431_v33 = vadd.f32 %v717_v30, %v930_v27  ;;  %v425_v34 = vpop.f32.mrb[9].mxu1  ;;  %505 = vadd.xlane.f32.xlu0 %v504_v31  ;;  %v470_v39 = vmul.f32 %v937_v32, %v447_v25 }
 0x1cf   :  { %v426_v35 = vadd.f32 %v930_v27, %v425_v34  ;;  %v469_v36 = vmul.f32 %v937_v32, %v446_v29 }
 0x1d0   :  { %v449_v37 = vmax.f32 %v431_v33, 0.0  ;;  %v513_v43 = vsel %vm473_vm2, %v470_v39, 0.0 }
 0x1d1   :  { %v448_v40 = vmax.f32 %v426_v35, 0.0  ;;  %508 = vadd.xlane.f32.xlu1 %v507_v38  ;;  %v510_v41 = vsel %vm473_vm2, %v469_v36, 0.0 }
 0x1d2   :  { %511 = vadd.xlane.f32.xlu0 %v510_v41  ;;  %v472_v44 = vmul.f32 %v937_v32, %v449_v37 }
 0x1d3   :  { %v471_v42 = vmul.f32 %v937_v32, %v448_v40 }
 0x1d4   :  { %v519_v45 = vsel %vm473_vm2, %v472_v44, 0.0 }
 0x1d5   :  { %514 = vadd.xlane.f32.xlu1 %v513_v43  ;;  %v516_v27 = vsel %vm473_vm2, %v471_v42, 0.0 }
 0x1d6   :  { %517 = vadd.xlane.f32.xlu0 %v516_v27 }
 0x1d9   :  { %520 = vadd.xlane.f32.xlu1 %v519_v45 }
 0x246   :  { %v479_v47 = vpop.xlane.xlu0 %478 }
 0x247   :  { %v530_v48 = vadd.f32 %v586_v46, %v479_v47 }
 0x249   :  { %547 = vst.msk [vmem:[%s1056_s7 + $0x8] sm:$0xff] %vm545_vm3, %v530_v48 }
 0x24a   :  { %v485_v49 = vpop.xlane.xlu1 %484  ;;  %v476_v50 = vpop.xlane.xlu0 %475 }
 0x24b   :  { %v532_v51 = vadd.f32 %v586_v46, %v485_v49  ;;  %v529_v32 = vadd.f32 %v586_v46, %v476_v50 }
 0x24d   :  { %549 = vst.msk [vmem:[%s1056_s7 + $0x18] sm:$0xff] %vm545_vm3, %v532_v51  ;;  %546 = vst.msk [vmem:[%s1056_s7] sm:$0xff] %vm545_vm3, %v529_v32 }
 0x24e   :  { %v482_v52 = vpop.xlane.xlu1 %481 }
 0x24f   :  { %v531_v53 = vadd.f32 %v586_v46, %v482_v52  ;;  %v488_v54 = vpop.xlane.xlu0 %487 }
 0x250   :  { %v533_v55 = vadd.f32 %v586_v46, %v488_v54 }
 0x251   :  { %548 = vst.msk [vmem:[%s1056_s7 + $0x10] sm:$0xff] %vm545_vm3, %v531_v53 }
 0x252   :  { %550 = vst.msk [vmem:[%s1056_s7 + $0x20] sm:$0xff] %vm545_vm3, %v533_v55  ;;  %v491_v56 = vpop.xlane.xlu1 %490 }
 0x253   :  { %v534_v57 = vadd.f32 %v586_v46, %v491_v56  ;;  %v494_v58 = vpop.xlane.xlu0 %493 }
 0x254   :  { %v535_v59 = vadd.f32 %v586_v46, %v494_v58 }
 0x255   :  { %551 = vst.msk [vmem:[%s1056_s7 + $0x28] sm:$0xff] %vm545_vm3, %v534_v57 }
 0x256   :  { %552 = vst.msk [vmem:[%s1056_s7 + $0x30] sm:$0xff] %vm545_vm3, %v535_v59  ;;  %v497_v60 = vpop.xlane.xlu1 %496 }
 0x257   :  { %v536_v61 = vadd.f32 %v586_v46, %v497_v60  ;;  %v500_v62 = vpop.xlane.xlu0 %499 }
 0x258   :  { %v537_v63 = vadd.f32 %v586_v46, %v500_v62 }
 0x259   :  { %553 = vst.msk [vmem:[%s1056_s7 + $0x38] sm:$0xff] %vm545_vm3, %v536_v61 }
 0x25a   :  { %554 = vst.msk [vmem:[%s1056_s7 + $0x40] sm:$0xff] %vm545_vm3, %v537_v63  ;;  %v503_v0 = vpop.xlane.xlu1 %502 }
 0x25b   :  { %v538_v1 = vadd.f32 %v586_v46, %v503_v0  ;;  %v506_v2 = vpop.xlane.xlu0 %505 }
 0x25c   :  { %v539_v3 = vadd.f32 %v586_v46, %v506_v2 }
 0x25d   :  { %555 = vst.msk [vmem:[%s1056_s7 + $0x48] sm:$0xff] %vm545_vm3, %v538_v1 }
 0x25e   :  { %556 = vst.msk [vmem:[%s1056_s7 + $0x50] sm:$0xff] %vm545_vm3, %v539_v3  ;;  %v509_v4 = vpop.xlane.xlu1 %508 }
 0x25f   :  { %v540_v5 = vadd.f32 %v586_v46, %v509_v4  ;;  %v512_v6 = vpop.xlane.xlu0 %511 }
 0x260   :  { %v541_v7 = vadd.f32 %v586_v46, %v512_v6 }
 0x261   :  { %557 = vst.msk [vmem:[%s1056_s7 + $0x58] sm:$0xff] %vm545_vm3, %v540_v5 }
 0x262   :  { %558 = vst.msk [vmem:[%s1056_s7 + $0x60] sm:$0xff] %vm545_vm3, %v541_v7  ;;  %v515_v8 = vpop.xlane.xlu1 %514 }
 0x263   :  { %v542_v9 = vadd.f32 %v586_v46, %v515_v8  ;;  %v518_v10 = vpop.xlane.xlu0 %517 }
 0x264   :  { %v543_v11 = vadd.f32 %v586_v46, %v518_v10 }
 0x265   :  { %559 = vst.msk [vmem:[%s1056_s7 + $0x68] sm:$0xff] %vm545_vm3, %v542_v9 }
 0x266   :  { %560 = vst.msk [vmem:[%s1056_s7 + $0x70] sm:$0xff] %vm545_vm3, %v543_v11  ;;  %v521_v12 = vpop.xlane.xlu1 %520 }
 0x267   :  { %v544_v13 = vadd.f32 %v586_v46, %v521_v12 }
 0x269   :  { %561 = vst.msk [vmem:[%s1056_s7 + $0x78] sm:$0xff] %vm545_vm3, %v544_v13 }

</bundles_post_ra>
